<compile_context>
chip_gen: v5e
topology: v5e:2x2
jax: 0.10.0
libtpu: 0.0.40
codegen_flags: <defaults>
</compile_context>

<pallas_src>
import jax
import jax.numpy as jnp
from jax.experimental import pallas as pl
from jax.experimental.pallas import tpu as pltpu

INPUT_SIZE = 2
HIDDEN_SIZE = 2
OUTPUT_SIZE = 1

_VMEM = pltpu.MemorySpace.VMEM
_SMEM = pltpu.MemorySpace.SMEM


def xornn_kernel(x_ref, w1_ref, b1_ref, w2_ref, b2_ref, o_ref):
    """Lane-dense XOR-MLP tile.

    x_ref : (2, TB) f32 VMEM  -- batch on the lane (last) axis
    w1    : (2, 2)  f32 SMEM
    b1    : (2,)    f32 SMEM
    w2    : (2, 1)  f32 SMEM
    b2    : (1,)    f32 SMEM
    o_ref : (1, TB) f32 VMEM  -- lane-dense, unmasked full-lane stores
    """
    # Hoist every SMEM scalar read (each use is an sld + vector broadcast and
    # JAX does not CSE broadcast_in_dim, so keep them out of any future loop).
    w1_00 = w1_ref[0, 0]
    w1_01 = w1_ref[0, 1]
    w1_10 = w1_ref[1, 0]
    w1_11 = w1_ref[1, 1]
    b1_0 = b1_ref[0]
    b1_1 = b1_ref[1]
    w2_0 = w2_ref[0, 0]
    w2_1 = w2_ref[1, 0]
    b2_0 = b2_ref[0]

    # Feature rows of the input: (1, TB) lane-dense slabs (static sublane slices).
    x0 = x_ref[0:1, :]
    x1 = x_ref[1:2, :]

    # layer1: Linear(2 -> 2) + bias as scalar-broadcast FMAs on the VPU
    # (K=2, N=2 would waste an entire MXU pass), then ReLU.
    h0 = jnp.maximum(x0 * w1_00 + x1 * w1_10 + b1_0, 0.0)
    h1 = jnp.maximum(x0 * w1_01 + x1 * w1_11 + b1_1, 0.0)

    # layer2: Linear(2 -> 1) + bias (2-term dot product, pure VPU).
    y = h0 * w2_0 + h1 * w2_1 + b2_0

    # Sigmoid through the EUP: exp + approximate reciprocal (keeps VALU headroom).
    o_ref[...] = pl.reciprocal(1.0 + jnp.exp(-y), approx=True)


def xornn_forward(x, w1, b1, w2, b2, *, batch_tile=262144, single_shot_max=524288):
    """x: (B, 2) f32. w1: (2,2), b1: (2,), w2: (2,1), b2: (1,). Returns (B, 1) f32."""
    B = x.shape[0]

    # Layout plumbing: put the batch on the lane axis (one cheap strided copy,
    # amortised by lane-dense compute/stores inside the kernel).
    xt = x.T  # (2, B)

    smem_spec = pl.BlockSpec(memory_space=_SMEM)

    if B <= single_shot_max:
        # Small/medium batch: single gridless invocation with full-array blocks
        # (full-array block shapes are exempt from the (8,128) divisibility rule).
        out = pl.pallas_call(
            xornn_kernel,
            out_shape=jax.ShapeDtypeStruct((OUTPUT_SIZE, B), jnp.float32),
            in_specs=[
                pl.BlockSpec(memory_space=_VMEM),   # x (2, B)
                smem_spec,                          # w1
                smem_spec,                          # b1
                smem_spec,                          # w2
                smem_spec,                          # b2
            ],
            out_specs=pl.BlockSpec(memory_space=_VMEM),
        )(xt, w1, b1, w2, b2)
    else:
        # Large batch: stream lane-dense (2, batch_tile) / (1, batch_tile) tiles
        # through a 1-D "parallel" batch grid (shards across v7x's 2 TCs).
        # No explicit padding: the ragged last block is masked by Pallas, which
        # is safe because every output lane depends only on its own input lane.
        num_blocks = pl.cdiv(B, batch_tile)
        out = pl.pallas_call(
            xornn_kernel,
            out_shape=jax.ShapeDtypeStruct((OUTPUT_SIZE, B), jnp.float32),
            grid=(num_blocks,),
            in_specs=[
                pl.BlockSpec((INPUT_SIZE, batch_tile), lambda i: (0, i)),   # x tile
                smem_spec,                                                  # w1
                smem_spec,                                                  # b1
                smem_spec,                                                  # w2
                smem_spec,                                                  # b2
            ],
            out_specs=pl.BlockSpec((OUTPUT_SIZE, batch_tile), lambda i: (0, i)),
            compiler_params=pltpu.CompilerParams(
                dimension_semantics=("parallel",)),
        )(xt, w1, b1, w2, b2)

    # (1, B) -> (B, 1): pure reshape, no data movement.
    return out.reshape(B, OUTPUT_SIZE)


def init_params(key):
    """Deterministic init matching PyTorch nn.Linear (uniform +-1/sqrt(fan_in))."""
    k1, k2, k3, k4 = jax.random.split(key, 4)
    bound1 = 1.0 / jnp.sqrt(float(INPUT_SIZE))
    bound2 = 1.0 / jnp.sqrt(float(HIDDEN_SIZE))
    w1 = jax.random.uniform(k1, (INPUT_SIZE, HIDDEN_SIZE), jnp.float32, -bound1, bound1)
    b1 = jax.random.uniform(k2, (HIDDEN_SIZE,), jnp.float32, -bound1, bound1)
    w2 = jax.random.uniform(k3, (HIDDEN_SIZE, OUTPUT_SIZE), jnp.float32, -bound2, bound2)
    b2 = jax.random.uniform(k4, (OUTPUT_SIZE,), jnp.float32, -bound2, bound2)
    return w1, b1, w2, b2


def xornn_ref(x, w1, b1, w2, b2):
    h = jnp.maximum(x @ w1 + b1, 0.0)
    return jax.nn.sigmoid(h @ w2 + b2)


if __name__ == "__main__":
    key = jax.random.PRNGKey(0)
    kx, kp = jax.random.split(key)
    w1, b1, w2, b2 = init_params(kp)

    # Classic XOR batch (4 samples, 2 features) -> gridless full-array path.
    x_small = jnp.array([[0.0, 0.0],
                         [0.0, 1.0],
                         [1.0, 0.0],
                         [1.0, 1.0]], dtype=jnp.float32)
    out_small = jax.block_until_ready(xornn_forward(x_small, w1, b1, w2, b2))
    ref_small = xornn_ref(x_small, w1, b1, w2, b2)
    assert out_small.shape == (4, OUTPUT_SIZE)
    assert jnp.allclose(out_small, ref_small, atol=1e-3, rtol=1e-3)

    # Larger batch with small tiles forced -> exercises the batch-tiled
    # "parallel" grid path, including the masked ragged last block (1000 = 3*256 + 232).
    x_big = jax.random.uniform(kx, (1000, INPUT_SIZE), jnp.float32)
    out_big = jax.block_until_ready(
        xornn_forward(x_big, w1, b1, w2, b2, batch_tile=256, single_shot_max=512))
    ref_big = xornn_ref(x_big, w1, b1, w2, b2)
    assert out_big.shape == (1000, OUTPUT_SIZE)
    assert jnp.allclose(out_big, ref_big, atol=1e-3, rtol=1e-3)

    print("KERNEL_OK")
</pallas_src>

<mosaic_0001>
module attributes {stable_mosaic.version = 11 : i64} {
  func.func @xornn_kernel(%arg0: memref<2x4xf32, #tpu.memory_space<vmem>>, %arg1: memref<2x2xf32, #tpu.memory_space<smem>>, %arg2: memref<2xf32, #tpu.memory_space<smem>>, %arg3: memref<2x1xf32, #tpu.memory_space<smem>>, %arg4: memref<1xf32, #tpu.memory_space<smem>>, %arg5: memref<1x4xf32, #tpu.memory_space<vmem>>) attributes {dimension_semantics = [], scalar_prefetch = 0 : i64, scratch_operands = 0 : i64, tpu.core_type = #tpu.core_type<tc>} {
    %c0 = arith.constant 0 : index
    %c0_0 = arith.constant 0 : index
    %0 = memref.load %arg1[%c0, %c0_0] : memref<2x2xf32, #tpu.memory_space<smem>>
    %c0_1 = arith.constant 0 : index
    %c1 = arith.constant 1 : index
    %1 = memref.load %arg1[%c0_1, %c1] : memref<2x2xf32, #tpu.memory_space<smem>>
    %c1_2 = arith.constant 1 : index
    %c0_3 = arith.constant 0 : index
    %2 = memref.load %arg1[%c1_2, %c0_3] : memref<2x2xf32, #tpu.memory_space<smem>>
    %c1_4 = arith.constant 1 : index
    %c1_5 = arith.constant 1 : index
    %3 = memref.load %arg1[%c1_4, %c1_5] : memref<2x2xf32, #tpu.memory_space<smem>>
    %c0_6 = arith.constant 0 : index
    %4 = memref.load %arg2[%c0_6] : memref<2xf32, #tpu.memory_space<smem>>
    %c1_7 = arith.constant 1 : index
    %5 = memref.load %arg2[%c1_7] : memref<2xf32, #tpu.memory_space<smem>>
    %c0_8 = arith.constant 0 : index
    %c0_9 = arith.constant 0 : index
    %6 = memref.load %arg3[%c0_8, %c0_9] : memref<2x1xf32, #tpu.memory_space<smem>>
    %c1_10 = arith.constant 1 : index
    %c0_11 = arith.constant 0 : index
    %7 = memref.load %arg3[%c1_10, %c0_11] : memref<2x1xf32, #tpu.memory_space<smem>>
    %c0_12 = arith.constant 0 : index
    %8 = memref.load %arg4[%c0_12] : memref<1xf32, #tpu.memory_space<smem>>
    %c0_13 = arith.constant 0 : index
    %c0_14 = arith.constant 0 : index
    %9 = vector.load %arg0[%c0_13, %c0_14] : memref<2x4xf32, #tpu.memory_space<vmem>>, vector<1x4xf32>
    %c1_15 = arith.constant 1 : index
    %c0_16 = arith.constant 0 : index
    %10 = vector.load %arg0[%c1_15, %c0_16] : memref<2x4xf32, #tpu.memory_space<vmem>>, vector<1x4xf32>
    %11 = vector.broadcast %0 : f32 to vector<1x4xf32>
    %12 = arith.mulf %9, %11 : vector<1x4xf32>
    %13 = vector.broadcast %2 : f32 to vector<1x4xf32>
    %14 = arith.mulf %10, %13 : vector<1x4xf32>
    %15 = arith.addf %12, %14 : vector<1x4xf32>
    %16 = vector.broadcast %4 : f32 to vector<1x4xf32>
    %17 = arith.addf %15, %16 : vector<1x4xf32>
    %cst = arith.constant 0.000000e+00 : f32
    %18 = vector.broadcast %cst : f32 to vector<1x4xf32>
    %19 = arith.maximumf %17, %18 : vector<1x4xf32>
    %20 = vector.broadcast %1 : f32 to vector<1x4xf32>
    %21 = arith.mulf %9, %20 : vector<1x4xf32>
    %22 = vector.broadcast %3 : f32 to vector<1x4xf32>
    %23 = arith.mulf %10, %22 : vector<1x4xf32>
    %24 = arith.addf %21, %23 : vector<1x4xf32>
    %25 = vector.broadcast %5 : f32 to vector<1x4xf32>
    %26 = arith.addf %24, %25 : vector<1x4xf32>
    %cst_17 = arith.constant 0.000000e+00 : f32
    %27 = vector.broadcast %cst_17 : f32 to vector<1x4xf32>
    %28 = arith.maximumf %26, %27 : vector<1x4xf32>
    %29 = vector.broadcast %6 : f32 to vector<1x4xf32>
    %30 = arith.mulf %19, %29 : vector<1x4xf32>
    %31 = vector.broadcast %7 : f32 to vector<1x4xf32>
    %32 = arith.mulf %28, %31 : vector<1x4xf32>
    %33 = arith.addf %30, %32 : vector<1x4xf32>
    %34 = vector.broadcast %8 : f32 to vector<1x4xf32>
    %35 = arith.addf %33, %34 : vector<1x4xf32>
    %cst_18 = arith.constant 0.000000e+00 : f32
    %36 = vector.broadcast %cst_18 : f32 to vector<1x4xf32>
    %37 = arith.subf %36, %35 : vector<1x4xf32>
    %38 = math.exp %37 : vector<1x4xf32>
    %cst_19 = arith.constant 1.000000e+00 : f32
    %39 = vector.broadcast %cst_19 : f32 to vector<1x4xf32>
    %40 = arith.addf %39, %38 : vector<1x4xf32>
    %41 = tpu.reciprocal %40 {approx = true} : vector<1x4xf32> -> vector<1x4xf32>
    %c0_20 = arith.constant 0 : index
    %c0_21 = arith.constant 0 : index
    %42 = vector.load %arg5[%c0_20, %c0_21] : memref<1x4xf32, #tpu.memory_space<vmem>>, vector<1x4xf32>
    tpu.vector_store %arg5[%c0_20, %c0_21], %41 {strides = array<i32>} : memref<1x4xf32, #tpu.memory_space<vmem>>, vector<1x4xf32>,
    return
  }
}

</mosaic_0001>

<bundles_post_ra>
// kernel: tpu_custom_call.1
= control target key start
LH: loop header
LB: loop body
LE: loop exit
PB: predicated region body
PF: predicated region fallthrough
CT: control target
= control target key end

     0   :  { %11 = vsyncpa [#allocation5], 0  ;;  %s251_s0 = inlined_call_operand.vmem [shape: f32[2,4], index: 0, kind: input, shape index: {}]   ;;  %s252_s1 = inlined_call_operand.vmem [shape: f32[2,2], index: 1, kind: input, shape index: {}]   ;;  %s253_s2 = inlined_call_operand.vmem [shape: f32[2], index: 2, kind: input, shape index: {}]   ;;  %s254_s3 = inlined_call_operand.vmem [shape: f32[2,1], index: 3, kind: input, shape index: {}]   ;;  %s255_s4 = inlined_call_operand.<no memory space> [shape: f32[1], index: 4, kind: input, shape index: {}]   ;;  %s256_s5 = inlined_call_operand.hbm [shape: f32[1,4], index: 5, kind: output, shape index: {}]  }
   0x1   :  { %12 = vsyncpa [#allocation7], 0  ;;  %s30_s20 = sshll.u32 %s253_s2, 4  ;;  %s31_s20 = int_to_ptr.vmem [resolvable:$true] %s30_s20 }
   0x2   :  { %13 = vsyncpa [#allocation4], 0  ;;  %s21_s23 = sshll.u32 %s252_s1, 4  ;;  %s196_s24 = smov [#allocation6]   ;;  %s22_s23 = int_to_ptr.vmem [resolvable:$true] %s21_s23 }
   0x3   :  { %33 = dma.vmem_to_smem %s31_s20, 16, %s196_s24, [#allocation7]  }
   0x4   :  { %s197_s25 = smov [#allocation3]   ;;  %s39_s28 = sshll.u32 %s254_s3, 4  ;;  %s40_s28 = int_to_ptr.vmem [resolvable:$true] %s39_s28 }
   0x5   :  { %24 = dma.vmem_to_smem %s22_s23, 32, %s197_s25, [#allocation5]  }
   0x6   :  { %s198_s29 = smov [#allocation8]  }
   0x7   :  { %42 = dma.vmem_to_smem %s40_s28, 32, %s198_s29, [#allocation7]  }
   0x8   :  { %190 = dma.done.wait [#allocation5], 32  }
   0x9   :  { %191 = vsyncadd [#allocation5], 4294967264 }
   0xa   :  { %192 = dma.done.wait [#allocation7], 48  }
   0xb   :  { %193 = vsyncadd [#allocation7], 4294967248 }
   0xc   :  { %57 = sfence }
   0xd   :  { %s58_s2 = sld [smem:[#allocation3]]  ;;  %v67_v0 = vld [vmem:[%s251_s0] sm:$0x1]  ;;  %v68_v1 = vld [vmem:[%s251_s0 + $0x1] sm:$0x1]  ;;  %v90_v22 = vstv %s255_s4  ;;  %s199_s15 = smov [#allocation9]  }
   0xe   :  { %s117_s30 = sld [smem:[#allocation3 + $0x1]]  ;;  %s104_s16 = sshll.u32 %s199_s15, 4  ;;  %vm97_vm0 = vcmask 24576   ;;  %s105_s16 = int_to_ptr.vmem [resolvable:$true] %s104_s16 }
   0xf   :  { %s118_s1 = sld [smem:[#allocation3 + $0x80]]  ;;  %s106_s19 = sshll.u32 %s256_s5, 4  ;;  %s107_s19 = int_to_ptr.hbm [resolvable:$true] %s106_s19 }
  0x10   :  { %s119_s6 = sld [smem:[#allocation3 + $0x81]] }
  0x11   :  { %s62_s7 = sld [smem:[#allocation6]] }
  0x12   :  { %s120_s10 = sld [smem:[#allocation6 + $0x1]] }
  0x13   :  { %s64_s11 = sld [smem:[#allocation8]]  ;;  %v69_v2 = vstv %s58_s2 }
  0x14   :  { %s121_s13 = sld [smem:[#allocation8 + $0x80]]  ;;  %v70_v3 = vmul.f32 %v69_v2, %v67_v0  ;;  %v77_v4 = vstv %s117_s30 }
  0x15   :  { %v71_v5 = vstv %s118_s1  ;;  %v78_v6 = vmul.f32 %v77_v4, %v67_v0 }
  0x16   :  { %v72_v7 = vmul.f32 %v71_v5, %v68_v1  ;;  %v79_v8 = vstv %s119_s6 }
  0x17   :  { %v74_v9 = vstv %s62_s7  ;;  %v80_v10 = vmul.f32 %v79_v8, %v68_v1 }
  0x18   :  { %v73_v11 = vadd.f32 %v72_v7, %v70_v3  ;;  %v82_v12 = vstv %s120_s10 }
  0x19   :  { %v81_v13 = vadd.f32 %v80_v10, %v78_v6  ;;  %v85_v16 = vstv %s64_s11 }
  0x1a   :  { %v75_v14 = vadd.f32 %v74_v9, %v73_v11  ;;  %v87_v18 = vstv %s121_s13 }
  0x1b   :  { %v83_v15 = vadd.f32 %v82_v12, %v81_v13 }
  0x1c   :  { %v76_v17 = vmax.f32 %v75_v14, 0.0 }
  0x1d   :  { %v84_v19 = vmax.f32 %v83_v15, 0.0 }
  0x1e   :  { %v86_v20 = vmul.f32 %v85_v16, %v76_v17 }
  0x1f   :  { %v88_v21 = vmul.f32 %v87_v18, %v84_v19 }
  0x21   :  { %v89_v23 = vadd.f32 %v88_v21, %v86_v20 }
  0x23   :  { %v91_v24 = vadd.f32 %v90_v22, %v89_v23 }
  0x25   :  { %v92_v25 = vsub.f32 0.0, %v91_v24 }
  0x27   :  { %v93_v26 = vmul.f32 1.442695, %v92_v25 }
  0x29   :  { %126 = vpow2.f32 %v93_v26 }
  0x2f   :  { %v127_v27 = vpop.eup %126 }
  0x30   :  { %v95_v28 = vadd.f32 1.0, %v127_v27 }
  0x32   :  { %128 = vrcp.f32 %v95_v28 }
  0x38   :  { %v129_v29 = vpop.eup %128 }
  0x39   :  { %98 = vst.msk [vmem:[#allocation9] sm:$0x1] %vm97_vm0, %v129_v29 }
  0x3a   :  { %109 = dma.vmem_to_hbm [thread:$0]  %s105_s16, 16, %s107_s19, [#allocation4]  }
  0x3b   :  { %194 = dma.done.wait [#allocation4], 16  }
  0x3c   :  { %195 = vsyncadd [#allocation4], 4294967280 }
  0x3d   :  { %114 = vsyncpa [#allocation4], 1 }
  0x3e   :  { %115 = vsyncpa [#allocation5], 1 }
  0x3f   :  { %116 = vsyncpa [#allocation7], 1 }

</bundles_post_ra>
